<compile_context>
chip_gen: v5e
topology: v5e:2x2
jax: 0.10.0
libtpu: 0.0.40
codegen_flags: <defaults>
</compile_context>

<pallas_src>
import functools

import jax
import jax.numpy as jnp
from jax import lax
from jax.experimental import pallas as pl
from jax.experimental.pallas import tpu as pltpu


def _round_up(v, m):
    return ((v + m - 1) // m) * m


def _sublane_pack(dtype):
    # native sublane packing per dtype width (f32 -> 8, bf16 -> 16, int8/fp8 -> 32)
    return {4: 8, 2: 16, 1: 32}.get(jnp.dtype(dtype).itemsize, 8)


def _vmem_capacity_bytes():
    try:
        info = pltpu.get_tpu_info()
        cap = getattr(info, "vmem_capacity_bytes", None)
        if cap:
            return int(cap)
    except Exception:
        pass
    return 64 * 1024 * 1024  # conservative default (v7x per-TensorCore)


def _causal_conv_kernel(x_halo_ref, x_cur_ref, w_ref, b_ref, o_ref, *,
                        k_size, dilation, hb, tl, use_panel):
    """One grid step = one (batch, L-tile) pair.

    x_halo_ref: (1, D_in_p, HB)       last HB lanes before this tile
                                      (clamped/garbage at the first tile)
    x_cur_ref:  (1, D_in_p, TL)       current sequence tile
    w_ref:      (D_out_p, K*D_in_p)   im2col weight      (use_panel=True)
                (K, D_out_p, D_in_p)  per-tap weight     (use_panel=False)
    b_ref:      (D_out_p, 1)          bias, f32 (resident)
    o_ref:      (1, D_out_p, TL)      output tile
    """
    ti = pl.program_id(1)

    cur = x_cur_ref[0]                                    # (D_in_p, TL)
    halo = x_halo_ref[0]                                  # (D_in_p, HB)
    # Causal boundary: the very first L-tile has no history -> zero the halo.
    halo = halo * (ti > 0).astype(halo.dtype)

    def tap_window(off):
        # window[:, t] = x[:, tile_start + t - off]  (zeros before seq start)
        if off == 0:
            return cur                                    # lane-aligned, no copy
        return jnp.concatenate([halo[:, hb - off:], cur[:, :tl - off]], axis=-1)

    if use_panel:
        # Small contraction: fold all K taps into ONE MXU matmul.
        windows = [tap_window((k_size - 1 - k) * dilation)
                   for k in range(k_size)]
        panel = jnp.concatenate(windows, axis=0) if k_size > 1 else windows[0]
        acc = jnp.dot(w_ref[...], panel,
                      preferred_element_type=jnp.float32)          # (D_out_p, TL)
    else:
        # Wide channels: K accumulated dots, no (K*D_in_p, TL) panel in VMEM.
        acc = jnp.dot(w_ref[k_size - 1], cur,                       # off == 0 tap
                      preferred_element_type=jnp.float32)
        for k in range(k_size - 1):
            off = (k_size - 1 - k) * dilation                       # static int
            acc += jnp.dot(w_ref[k], tap_window(off),
                           preferred_element_type=jnp.float32)

    acc = acc + b_ref[...]                                          # bias (f32)
    o_ref[0, :, :] = acc.astype(o_ref.dtype)


def causal_conv1d(x, weight, bias, *, dilation):
    """x: (B, D_in, L), weight: (D_out, D_in, K), bias: (D_out,) -> (B, D_out, L)."""
    B, D_in, L = x.shape
    D_out, _, K = weight.shape
    pad = (K - 1) * dilation

    itemsize = jnp.dtype(x.dtype).itemsize
    pack = _sublane_pack(x.dtype)
    D_in_p = _round_up(D_in, pack)
    D_out_p = _round_up(D_out, pack)

    # Single-matmul im2col only while the folded contraction fits one MXU pass.
    use_panel = (K * D_in_p) <= 128

    HB = _round_up(max(pad, 1), 128)             # halo block (lane aligned, >= pad)

    # ---- sequence tile selection: TL = r * HB lanes --------------------------
    vmem_cap = _vmem_capacity_bytes()
    budget = int(0.70 * vmem_cap)                # headroom for Mosaic internal scratch

    def working_set(tl):
        blk_in = D_in_p * (tl + HB) * itemsize               # halo + cur blocks
        blk_out = D_out_p * tl * itemsize
        dbuf = 2 * (blk_in + blk_out)                        # double-buffered pipeline
        wb = K * D_out_p * D_in_p * itemsize + D_out_p * 4   # resident weight + f32 bias
        panel = K * D_in_p * tl * itemsize if use_panel else 0
        windows = 2 * D_in_p * tl * itemsize                 # shifted-window temporaries
        acc = D_out_p * tl * 4                               # f32 accumulator
        return dbuf + wb + panel + windows + acc

    L_hb = _round_up(L, HB)
    n_hb_total = L_hb // HB
    r = min(n_hb_total, max(1, 8192 // HB))      # cap tile at ~8192 lanes
    while r > 1 and working_set(r * HB) > budget:
        r -= 1
    # Keep both TensorCores busy (v7x) when the batch alone can't: >= 2 L-tiles.
    if B == 1:
        while r > 1 and (n_hb_total + r - 1) // r < 2:
            r -= 1
    TL = r * HB
    Lp = _round_up(L, TL)
    n_lt = Lp // TL

    # ---- glue: alignment padding only (no causal left-pad of the sequence) ---
    if D_in_p != D_in or Lp != L:
        x = jnp.pad(x, ((0, 0), (0, D_in_p - D_in), (0, Lp - L)))

    if use_panel:
        # (D_out_p, K*D_in_p), columns ordered [tap k][channel c] to match the
        # in-kernel im2col panel rows.
        w = jnp.transpose(weight, (0, 2, 1))                 # (D_out, K, D_in)
        w = jnp.pad(w, ((0, D_out_p - D_out), (0, 0), (0, D_in_p - D_in)))
        w = w.reshape(D_out_p, K * D_in_p).astype(x.dtype)
        w_spec = pl.BlockSpec((D_out_p, K * D_in_p), lambda b, t: (0, 0))
    else:
        # (K, D_out_p, D_in_p): lane-aligned per-tap slabs for K accumulated dots.
        w = jnp.transpose(weight, (2, 0, 1))                 # (K, D_out, D_in)
        w = jnp.pad(w, ((0, 0), (0, D_out_p - D_out), (0, D_in_p - D_in)))
        w = w.astype(x.dtype)
        w_spec = pl.BlockSpec((K, D_out_p, D_in_p), lambda b, t: (0, 0, 0))

    b2 = jnp.pad(bias, (0, D_out_p - D_out)).astype(jnp.float32).reshape(D_out_p, 1)

    kernel = functools.partial(_causal_conv_kernel, k_size=K, dilation=dilation,
                               hb=HB, tl=TL, use_panel=use_panel)

    vmem_limit = int(min(int(0.90 * vmem_cap),
                         max(32 * 1024 * 1024, int(1.25 * working_set(TL)))))

    cost = pl.CostEstimate(
        flops=int(2 * B * D_out * D_in * K * L),
        transcendentals=0,
        bytes_accessed=int((x.size + w.size + B * D_out_p * Lp) * itemsize
                           + b2.size * 4),
    )

    out = pl.pallas_call(
        kernel,
        out_shape=jax.ShapeDtypeStruct((B, D_out_p, Lp), x.dtype),
        grid_spec=pltpu.PrefetchScalarGridSpec(
            num_scalar_prefetch=0,
            grid=(B, n_lt),
            in_specs=[
                # Halo: the HB lanes ending at this tile's start (block index
                # clamped to 0 for the first tile; kernel zeroes it there).
                pl.BlockSpec((1, D_in_p, HB),
                             lambda b, t: (b, 0, jnp.maximum(t * r - 1, 0))),
                # Current sequence tile.
                pl.BlockSpec((1, D_in_p, TL), lambda b, t: (b, 0, t)),
                # Resident weight / bias (constant block index -> fetched once).
                w_spec,
                pl.BlockSpec((D_out_p, 1), lambda b, t: (0, 0)),
            ],
            out_specs=pl.BlockSpec((1, D_out_p, TL), lambda b, t: (b, 0, t)),
        ),
        compiler_params=pltpu.CompilerParams(
            dimension_semantics=("parallel", "parallel"),
            vmem_limit_bytes=vmem_limit),
        cost_estimate=cost,
    )(x, x, w, b2)

    return out[:, :D_out, :L]


def _reference(x, weight, bias, *, dilation):
    """Pure-JAX reference matching torch.nn.Conv1d(..., padding=pad)[:, :, :L]."""
    K = weight.shape[-1]
    pad = (K - 1) * dilation
    y = lax.conv_general_dilated(
        x, weight,
        window_strides=(1,),
        padding=[(pad, pad)],
        rhs_dilation=(dilation,),
        dimension_numbers=("NCH", "OIH", "NCH"),
    )
    y = y + bias.reshape(1, -1, 1)
    return y[:, :, :x.shape[2]]


if __name__ == "__main__":
    # Small shapes consistent with the module: batch=2, D_in=4, D_out=6, L=16.
    B, D_in, D_out, L = 2, 4, 6, 16
    k_size, dilation = 3, 2

    key = jax.random.PRNGKey(0)
    kx, kw, kb = jax.random.split(key, 3)
    x = jax.random.normal(kx, (B, D_in, L), dtype=jnp.float32)
    # Deterministic parameter init (Conv1d shapes: (D_out, D_in, k_size), (D_out,)).
    weight = jax.random.normal(kw, (D_out, D_in, k_size), dtype=jnp.float32) * 0.1
    bias = jax.random.normal(kb, (D_out,), dtype=jnp.float32) * 0.1

    out = causal_conv1d(x, weight, bias, dilation=dilation)
    out = jax.block_until_ready(out)

    ref = _reference(x, weight, bias, dilation=dilation)
    assert out.shape == (B, D_out, L)
    assert jnp.allclose(out, ref, atol=1e-5, rtol=1e-5)

    print("KERNEL_OK")
</pallas_src>

<mosaic_0001>
module attributes {stable_mosaic.version = 11 : i64} {
  func.func @_causal_conv_kernel(%arg0: i32, %arg1: i32, %arg2: memref<1x8x128xf32, #tpu.memory_space<vmem>>, %arg3: memref<1x8x128xf32, #tpu.memory_space<vmem>>, %arg4: memref<8x24xf32, #tpu.memory_space<vmem>>, %arg5: memref<8x1xf32, #tpu.memory_space<vmem>>, %arg6: memref<1x8x128xf32, #tpu.memory_space<vmem>>) attributes {dimension_semantics = [#tpu.dimension_semantics<parallel>, #tpu.dimension_semantics<parallel>], iteration_bounds = array<i64: 2, 1>, scalar_prefetch = 0 : i64, scratch_operands = 0 : i64, tpu.core_type = #tpu.core_type<tc>, window_params = [{transform_indices = @transform_0, window_bounds = array<i64: 1, 8, 128>}, {transform_indices = @transform_1, window_bounds = array<i64: 1, 8, 128>}, {pipeline_mode = #tpu.pipeline_mode<synchronous>, transform_indices = @transform_2, window_bounds = array<i64: 8, 24>}, {pipeline_mode = #tpu.pipeline_mode<synchronous>, transform_indices = @transform_3, window_bounds = array<i64: 8, 1>}, {transform_indices = @transform_4, window_bounds = array<i64: 1, 8, 128>}]} {
    %c0 = arith.constant 0 : index
    %c0_0 = arith.constant 0 : index
    %c0_1 = arith.constant 0 : index
    %0 = vector.load %arg3[%c0, %c0_0, %c0_1] : memref<1x8x128xf32, #tpu.memory_space<vmem>>, vector<1x8x128xf32>
    %1 = vector.shape_cast %0 : vector<1x8x128xf32> to vector<8x128xf32>
    %c0_2 = arith.constant 0 : index
    %c0_3 = arith.constant 0 : index
    %c0_4 = arith.constant 0 : index
    %2 = vector.load %arg2[%c0_2, %c0_3, %c0_4] : memref<1x8x128xf32, #tpu.memory_space<vmem>>, vector<1x8x128xf32>
    %3 = vector.shape_cast %2 : vector<1x8x128xf32> to vector<8x128xf32>
    %c0_i32 = arith.constant 0 : i32
    %4 = arith.cmpi sgt, %arg1, %c0_i32 : i32
    %5 = arith.extui %4 : i1 to i32
    %6 = arith.sitofp %5 : i32 to f32
    %7 = vector.broadcast %6 : f32 to vector<8x128xf32>
    %8 = arith.mulf %3, %7 : vector<8x128xf32>
    %9 = vector.extract_strided_slice %8 {offsets = [0, 124], sizes = [8, 4], strides = [1, 1]} : vector<8x128xf32> to vector<8x4xf32>
    %10 = vector.extract_strided_slice %1 {offsets = [0, 0], sizes = [8, 124], strides = [1, 1]} : vector<8x128xf32> to vector<8x124xf32>
    %11 = tpu.concatenate %9, %10 in 1 : vector<8x4xf32>, vector<8x124xf32> -> vector<8x128xf32>
    %12 = vector.extract_strided_slice %8 {offsets = [0, 126], sizes = [8, 2], strides = [1, 1]} : vector<8x128xf32> to vector<8x2xf32>
    %13 = vector.extract_strided_slice %1 {offsets = [0, 0], sizes = [8, 126], strides = [1, 1]} : vector<8x128xf32> to vector<8x126xf32>
    %14 = tpu.concatenate %12, %13 in 1 : vector<8x2xf32>, vector<8x126xf32> -> vector<8x128xf32>
    %15 = tpu.concatenate %11, %14, %1 in 0 : vector<8x128xf32>, vector<8x128xf32>, vector<8x128xf32> -> vector<24x128xf32>
    %c0_5 = arith.constant 0 : index
    %c0_6 = arith.constant 0 : index
    %16 = vector.load %arg4[%c0_5, %c0_6] : memref<8x24xf32, #tpu.memory_space<vmem>>, vector<8x24xf32>
    %cst = arith.constant dense<0.000000e+00> : vector<8x128xf32>
    %17 = tpu.matmul %16, %15, %cst {dimension_numbers = #tpu.dot_dimension_numbers<[1], [0], [0], [1], [0, 0, 1, 1], [], []>} : vector<8x24xf32>, vector<24x128xf32>, vector<8x128xf32> -> vector<8x128xf32>
    %c0_7 = arith.constant 0 : index
    %c0_8 = arith.constant 0 : index
    %18 = vector.load %arg5[%c0_7, %c0_8] : memref<8x1xf32, #tpu.memory_space<vmem>>, vector<8x1xf32>
    %19 = vector.broadcast %18 : vector<8x1xf32> to vector<8x128xf32>
    %20 = arith.addf %17, %19 : vector<8x128xf32>
    %c0_9 = arith.constant 0 : index
    %c0_10 = arith.constant 0 : index
    %c0_11 = arith.constant 0 : index
    %21 = vector.load %arg6[%c0_9, %c0_10, %c0_11] : memref<1x8x128xf32, #tpu.memory_space<vmem>>, vector<1x8x128xf32>
    %22 = vector.shape_cast %21 : vector<1x8x128xf32> to vector<8x128xf32>
    %23 = vector.shape_cast %20 : vector<8x128xf32> to vector<1x8x128xf32>
    tpu.vector_store %arg6[%c0_9, %c0_10, %c0_11], %23 {strides = array<i32>} : memref<1x8x128xf32, #tpu.memory_space<vmem>>, vector<1x8x128xf32>,
    return
  }
  func.func @transform_0(%arg0: i32, %arg1: i32) -> (i32, i32, i32) {
    %c1_i32 = arith.constant 1 : i32
    %0 = arith.muli %arg1, %c1_i32 : i32
    %c1_i32_0 = arith.constant 1 : i32
    %1 = arith.subi %0, %c1_i32_0 : i32
    %c0_i32 = arith.constant 0 : i32
    %2 = arith.maxsi %1, %c0_i32 : i32
    %c0_i32_1 = arith.constant 0 : i32
    %c0_i32_2 = arith.constant 0 : i32
    return %arg0, %c0_i32_1, %2 : i32, i32, i32
  }
  func.func @transform_1(%arg0: i32, %arg1: i32) -> (i32, i32, i32) {
    %c0_i32 = arith.constant 0 : i32
    %c0_i32_0 = arith.constant 0 : i32
    return %arg0, %c0_i32, %arg1 : i32, i32, i32
  }
  func.func @transform_2(%arg0: i32, %arg1: i32) -> (i32, i32) {
    %c0_i32 = arith.constant 0 : i32
    %c0_i32_0 = arith.constant 0 : i32
    %c0_i32_1 = arith.constant 0 : i32
    return %c0_i32, %c0_i32_0 : i32, i32
  }
  func.func @transform_3(%arg0: i32, %arg1: i32) -> (i32, i32) {
    %c0_i32 = arith.constant 0 : i32
    %c0_i32_0 = arith.constant 0 : i32
    %c0_i32_1 = arith.constant 0 : i32
    return %c0_i32, %c0_i32_0 : i32, i32
  }
  func.func @transform_4(%arg0: i32, %arg1: i32) -> (i32, i32, i32) {
    %c0_i32 = arith.constant 0 : i32
    %c0_i32_0 = arith.constant 0 : i32
    return %arg0, %c0_i32, %arg1 : i32, i32, i32
  }
}

</mosaic_0001>

<bundles_post_ra>
// kernel: tpu_custom_call.1
= control target key start
LH: loop header
LB: loop body
LE: loop exit
PB: predicated region body
PF: predicated region fallthrough
CT: control target
= control target key end

     0   :  { %9 = vsyncpa [#allocation3], 0  ;;  %s878_s0 = inlined_call_operand.hbm [shape: f32[2,8,128], index: 0, kind: input, shape index: {}]   ;;  %s879_s1 = inlined_call_operand.hbm [shape: f32[2,8,128], index: 1, kind: input, shape index: {}]   ;;  %s880_s2 = inlined_call_operand.vmem [shape: f32[8,24], index: 2, kind: input, shape index: {}]   ;;  %s881_s3 = inlined_call_operand.vmem [shape: f32[8,1], index: 3, kind: input, shape index: {}]   ;;  %s882_s4 = inlined_call_operand.hbm [shape: f32[2,8,128], index: 4, kind: output, shape index: {}]  }
   0x1   :  { %11 = vsyncpa [#allocation3 + $0x1], 0 }
   0x2   :  { %12 = vsyncpa [#allocation6], 0 }
   0x3   :  { %14 = vsyncpa [#allocation6 + $0x1], 0 }
   0x4   :  { %15 = vsyncpa [#allocation4], 0 }
   0x5   :  { %17 = vsyncpa [#allocation4 + $0x1], 0  ;;  %s739_s15 = smov 0   ;;  %s741_s16 = smov 0  }
   0x6   :  { %s743_s17 = smov 0   ;;  %s745_s18 = smov 0  }
   0x7   :  { %s747_s19 = smov 0   ;;  %s749_s20 = smov 0  }
   0x8 LB: > { %s464_s21 = sadd.s32 4294967295, %s709_s20   ;;  %s465_s22 = sadd.s32 4294967294, %s709_s20   ;;  %s709_s20 = sphi %s749_s20, %s23_s20   ;;  %s705_s19 = sphi %s747_s19, %s894_s19   ;;  %s701_s18 = sphi %s745_s18, %s893_s18   ;;  %s697_s17 = sphi %s743_s17, %s892_s17   ;;  %s693_s16 = sphi %s741_s16, %s891_s16   ;;  %s689_s15 = sphi %s739_s15, %s890_s15  }
   0x9   : > { %s35_s23 = sadd.s32 1, %s705_s19  ;;  %s50_s24 = sadd.s32 1, %s697_s17 }
   0xa   : > { %p37_p0 = scmp.ge.s32.totalorder %s35_s23, 2  ;;  %p57_p1 = scmp.ne.s32.totalorder %s697_s17, %s693_s16 }
   0xb   : > { %p58_p2 = scmp.eq.s32.totalorder %s709_s20, 0  ;;  %p63_p3 = scmp.ne.s32.totalorder %s693_s16, %s689_s15 }
   0xc   : > { %s896_s23 = smov (%p37_p0, %s35_s23), 0  ;;  %p64_p5 = scmp.eq.s32.totalorder %s464_s21, 0 }
   0xd   : > { %884 = sst [smem:[#allocation11_spill]] %s896_s23  ;;  %p780_p4 = por %p58_p2, %p57_p1 }
   0xe   : > { %s45_s26 = ssub.s32 %s705_s19, %s896_s23  ;;  %p159_p6 = scmp.eq.s32.totalorder %s464_s21, 1 }
   0xf   : > { %p48_p7 = scmp.eq.s32.totalorder %s45_s26, 0  ;;  %p786_p8 = por %p64_p5, %p63_p3 }
  0x10   : > { %p790_p9 = por %p159_p6, %p57_p1  ;;  %p165_p10 = scmp.eq.s32.totalorder %s465_s22, 1 }
  0x11   : > { %s795_s29 = scalar_select %p48_p7, %s697_s17, %s50_s24  }
  0x12   : > { %p797_p11 = por %p165_p10, %p63_p3  ;;  %p467_p12 = scmp.ge.s32.totalorder %s709_s20, 2 }
  0x13   : > { %p498_p13 = scmp.lt.s32.totalorder %s709_s20, 2  ;;  %s191_s5 = sand.u32 1, %s697_s17  }
  0x14   : > { %s468_s6 = sshll.u32 %s191_s5, 3  ;;  %s469_s7 = sshll.u32 %s705_s19, 3 }
  0x15   : > { %s203_s10 = scalar_lea.hbm %s878_s0, %s469_s7  ;;  %s195_s11 = scalar_lea.vmem [#allocation2], %s468_s6 }
  0x16   : > { %s207_s12 = sshll.u32 %s195_s11, 4  ;;  %s205_s13 = sshll.u32 %s203_s10, 4  ;;  %s208_s12 = int_to_ptr.vmem [resolvable:$true] %s207_s12  ;;  %s206_s13 = int_to_ptr.hbm [resolvable:$true] %s205_s13 }
  0x17   : > { %p488_p0 = pnand %p498_p13, %p780_p4  ;;  %p472_p1 = scmp.ge.s32.totalorder %s709_s20, 1 }
  0x18   : > { %p232_p2 = scmp.lt.s32.totalorder %s709_s20, 3  ;;  %s192_s14 = scalar_lea.sflag [#allocation3], %s191_s5 }
  0x19   : > { %490 = dma.hbm_to_vmem [thread:$0]  (!%p488_p0), %s206_s13, 128, %s208_s12, %s192_s14  }
  0x1a   : > { %p233_p3 = pnand %p472_p1, %p232_p2  ;;  %s223_s24 = scalar_lea.hbm %s879_s1, %s469_s7 }
  0x1b   : > { %s218_s26 = scalar_lea.vmem [#allocation5], %s468_s6  ;;  %s225_s8 = sshll.u32 %s223_s24, 4  ;;  %s226_s8 = int_to_ptr.hbm [resolvable:$true] %s225_s8 }
  0x1c   : > { %s227_s23 = sshll.u32 %s218_s26, 4  ;;  %s215_s9 = scalar_lea.sflag [#allocation6], %s191_s5  ;;  %s228_s23 = int_to_ptr.vmem [resolvable:$true] %s227_s23 }
  0x1d   : > { %493 = dma.hbm_to_vmem [thread:$0]  (!%p488_p0), %s226_s8, 128, %s228_s23, %s215_s9  }
  0x1e   : > { %236 = sbr.rel (%p233_p3) target bundleno = 301 (0x12d), region = 36  ;;  %s816_s25 = sand.u32 (!%p233_p3), 1, %s693_s16  }
  0x1f   : > { %s819_s10 = sshll.u32 (!%p233_p3), %s816_s25, 3  ;;  %s239_s11 = scalar_lea.sflag (!%p233_p3), [#allocation3], %s816_s25 }
  0x20   : > { %s242_s12 = scalar_lea.vmem (!%p233_p3), [#allocation2], %s819_s10 }
  0x23   : > { %676 = dma.done.wait (%p786_p8), %s239_s11, 128  }
  0x24   : > { %678 = vsyncadd (%p786_p8), %s239_s11, 4294967168  ;;  %s249_s23 = scalar_lea.sflag [#allocation6], %s816_s25  ;;  %s252_s5 = scalar_lea.vmem [#allocation5], %s819_s10 }
  0x25   : > { %680 = dma.done.wait (%p786_p8), %s249_s23, 128  }
  0x26   : > { %682 = vsyncadd (%p786_p8), %s249_s23, 4294967168  ;;  %v286_v0 = vld [vmem:[%s252_s5] sm:$0xff]  ;;  %v287_v1 = vld [vmem:[%s242_s12] sm:$0xff]  ;;  %s711_s6 = smov 2   ;;  %s712_s7 = smov 4   ;;  %v713_v5 = vmov 0  }
  0x27   : > { %v292_v2 = vmul.f32 0.0, %v287_v1  ;;  %335 = vmatpush.msra.mxu0 %v286_v0  ;;  %v312_v4 = vld [vmem:[%s881_s3] sm:$0xff]  ;;  %561 = vset.pattern.permute.xlu1 %v713_v5  ;;  %vm309_vm0 = vcmask 15360   ;;  %vm301_vm1 = vcmask 31744   ;;  %vm318_vm2 = vcmask 195584   ;;  %s478_s22 = sshll.u32 %s701_s18, 3 }
  0x28   : > { %562 = vset.pattern.permute.xlu0 %v713_v5  ;;  %315 = vperm.xlu1 %561, %v312_v4   ;;  %v311_v13 = vld [vmem:[%s880_s2] sm:$0xff]  ;;  %s355_s8 = scalar_lea.hbm %s882_s4, %s478_s22  ;;  %s282_s9 = scalar_lea.vmem [#allocation7], %s819_s10 }
  0x29   : > { %v551_v3 = vpack.i.bf16 %v286_v0, %v292_v2  ;;  %s357_s11 = sshll.u32 %s282_s9, 4  ;;  %s359_s12 = sshll.u32 %s355_s8, 4  ;;  %s358_s11 = int_to_ptr.vmem [resolvable:$true] %s357_s11  ;;  %s360_s12 = int_to_ptr.hbm [resolvable:$true] %s359_s12 }
  0x2a   : > { %s344_s23 = scalar_lea.sflag [#allocation4], %s816_s25  ;;  %s637_s5 = sshra.s32 %s360_s12, 4  ;;  %s638_s5 = int_to_ptr.hbm [resolvable:$true] %s637_s5 }
  0x2b   : > { %552 = vrot.lane.b32.xlu0 %v551_v3, %s711_s6  ;;  %s639_s6 = scalar_lea.hbm %s638_s5, 8  ;;  %s643_s13 = scalar_lea.hbm %s882_s4, 16 }
  0x2c   : > { %p640_p4 = scmp.ne.s32.totalorder %s638_s5, %s639_s6  ;;  %p644_p7 = scmp.lt.s32.totalorder %s638_s5, %s882_s4 }
  0x2d   : > { %p645_p8 = scmp.lt.s32.totalorder %s643_s13, %s639_s6 }
  0x2e   : > { %p641_p5 = pnand %p640_p4, %p790_p9 }
  0x2f   : > { %p646_p10 = por %p645_p8, %p644_p7 }
  0x30   : > { %p642_p6 = pneg %p641_p5 }
  0x32   : > { %p647_p13 = pnand %p646_p10, %p642_p6 }
  0x33   : > { %557 = vrot.lane.b32.xlu0 %v551_v3, %s712_s7 }
  0x9a   : > { %v316_v15 = vpop.permute.xlu1 %315 }
  0x9d   : > { %v553_v6 = vpop.permute.xlu0 %552 }
  0x9e   : > { %v555_v7 = vunpack.i.h.bf16 %v553_v6  ;;  %v554_v8 = vunpack.i.l.bf16 %v553_v6 }
  0xa0   : > { %v310_v9 = vsel %vm309_vm0, %v554_v8, %v555_v7 }
  0xa1   : > { %336 = vmatpush.msra.mxu0 %v310_v9 }
  0xa5   : > { %v558_v10 = vpop.permute.xlu0 %557 }
  0xa6   : > { %v560_v11 = vunpack.i.h.bf16 %v558_v10  ;;  %v559_v12 = vunpack.i.l.bf16 %v558_v10 }
  0xa8   : > { %v302_v14 = vsel %vm301_vm1, %v559_v12, %v560_v11 }
  0xa9   : > { %337 = vmatpush.msra.mxu0 %v302_v14 }
  0xaa   : > { %476 = vmatmul.msk.f32.vlgmr.msra.gmra.mxu0 %vm318_vm2, %v311_v13 }
 0x127   : > { %v339_v16 = vpop.f32.mrf.mxu0 }
 0x128   : > { %v340_v17 = vadd.f32 %v339_v16, %v316_v15 }
 0x12a   : > { %342 = vst [vmem:[%s282_s9] sm:$0xff] %v340_v17 }
 0x12b   : > { %650 = shalt.err (!%p647_p13)
}
 0x12c   : > { %485 = dma.vmem_to_hbm [thread:$0]  (%p790_p9), %s358_s11, 128, %s360_s12, %s344_s23  }
 0x12d PF: > { %s371_s25 = sand.u32 1, %s689_s15   ;;  %p495_p0 = pnand %p467_p12, %p797_p11 }
 0x12e   : > { %s372_s27 = scalar_lea.sflag [#allocation4], %s371_s25 }
 0x12f   : > { %p496_p1 = pneg %p495_p0 }
 0x131   : > { %684 = dma.done.wait (%p496_p1), %s372_s27, 128  }
 0x132   : > { %686 = vsyncadd (%p496_p1), %s372_s27, 4294967168  ;;  %s23_s20 = sadd.s32 1, %s709_s20   ;;  %s889_s28 = sld [smem:[#allocation11_spill]] }
 0x133   : > { %p20_p2 = scmp.ge.s32.totalorder %s23_s20, 4   ;;  %s890_s15 = smov %s693_s16 }
 0x134   : > { %s891_s16 = smov %s697_s17  ;;  %s892_s17 = smov %s795_s29 }
 0x135   : > { %s893_s18 = smov %s705_s19  ;;  %22 = sbr.rel (!%p20_p2) target bundleno = 8 (0x8), region = 94 }
 0x138   : > { %s894_s19 = smov %s889_s28 }
 0x13a   :  { %378 = vsyncpa [#allocation3], 1 }
 0x13b   :  { %380 = vsyncpa [#allocation3 + $0x1], 1 }
 0x13c   :  { %381 = vsyncpa [#allocation6], 1 }
 0x13d   :  { %383 = vsyncpa [#allocation6 + $0x1], 1 }
 0x13e   :  { %384 = vsyncpa [#allocation4], 1 }
 0x13f   :  { %386 = vsyncpa [#allocation4 + $0x1], 1 }

</bundles_post_ra>
